<compile_context>
chip_gen: v7x
topology: tpu7x:2x2x1
jax: 0.10.0
libtpu: 0.0.40
codegen_flags: <defaults>
</compile_context>

<pallas_src>
import functools

import jax
import jax.numpy as jnp
from jax.experimental import pallas as pl
from jax.experimental.pallas import tpu as pltpu


# ---------------------------------------------------------------------------
# Phase 1: g = PReLU(conv1(x));  cmat += g @ g^T   (N-tiled reduction)
# ---------------------------------------------------------------------------
def _sapca_phase1_kernel(x_ref, w1_ref, b1_ref, a_ref, cmat_ref, *,
                         n_tile, n_valid):
    t = pl.program_id(1)

    x = x_ref[0]                                                      # (C, Nt)
    g = jnp.dot(w1_ref[...], x, preferred_element_type=jnp.float32) + b1_ref[...]
    alpha = a_ref[0]                                                  # SMEM scalar
    g = jnp.where(g >= 0.0, g, alpha * g)                             # PReLU

    if n_valid is not None:
        # N was padded up to a multiple of 128: zero padded columns so they do
        # not contaminate the Gram matrix.
        col = jax.lax.broadcasted_iota(jnp.int32, g.shape, 1) + t * n_tile
        g = jnp.where(col < n_valid, g, 0.0)

    @pl.when(t == 0)
    def _():
        cmat_ref[0] = jnp.zeros_like(cmat_ref[0])

    # Accumulate the (C, C) Gram matrix; contract over the spatial/lane axis.
    gram = jax.lax.dot_general(g, g, (((1,), (1,)), ((), ())),
                               preferred_element_type=jnp.float32)
    cmat_ref[0] = cmat_ref[0] + gram


# ---------------------------------------------------------------------------
# Phase 2: g = PReLU(conv1(x)) (recomputed);  y = sigmoid(wproj @ g);
#          att = conv2(y);  out = x * tanh(att)
# ---------------------------------------------------------------------------
def _sapca_phase2_kernel(x_ref, w1_ref, b1_ref, a_ref, wproj_ref, w2_ref,
                         b2_ref, o_ref):
    x = x_ref[0]                                                      # (C, Nt)
    g = jnp.dot(w1_ref[...], x, preferred_element_type=jnp.float32) + b1_ref[...]
    alpha = a_ref[0]
    g = jnp.where(g >= 0.0, g, alpha * g)                             # PReLU

    y = jax.nn.sigmoid(
        jnp.dot(wproj_ref[0], g, preferred_element_type=jnp.float32))  # (Ci, Nt)
    att = jnp.dot(w2_ref[...], y, preferred_element_type=jnp.float32) + b2_ref[...]
    o_ref[0] = (x * jnp.tanh(att)).astype(o_ref.dtype)                # (C, Nt)


def _pick_n_tile(n, c, target_bytes=4 << 20):
    """Largest divisor of n that is a multiple of 128 and keeps a (c, n_tile)
    f32 slab around ~4 MiB, so the double-buffered streams of both phases stay
    comfortably inside the explicit 48 MiB VMEM budget on v5e/v6e/v7x while
    reaching the >=85%-of-roofline tile-size regime."""
    if n % 128 != 0:            # callers pad first; keep a safe fallback
        return n
    cap = max(128, (target_bytes // (4 * c)) // 128 * 128)
    best = 128
    t = 128
    while t <= min(n, cap):
        if n % t == 0:
            best = t
        t += 128
    return best


def sapca_v2_pallas(x, params, n_tile=None):
    """x: (B, C, H, W) float32, C % 4 == 0. Returns (B, C, H, W)."""
    B, C, Hh, Ww = x.shape
    N = Hh * Ww
    w1, b1, a, w2, b2 = params
    Ci = w2.shape[1]                      # = C // 4

    # Pad the spatial axis to a multiple of 128 (lane-dense DMAs / stores).
    N_pad = ((N + 127) // 128) * 128
    if n_tile is None:
        n_tile = _pick_n_tile(N_pad, C)
    assert N_pad % n_tile == 0
    nt = N_pad // n_tile
    n_valid = N if N_pad != N else None

    xf = x.reshape(B, C, N)
    if N_pad != N:
        xf = jnp.pad(xf, ((0, 0), (0, 0), (0, N_pad - N)))

    const = lambda b, t: (0, 0)
    smem_spec = pl.BlockSpec(memory_space=pltpu.MemorySpace.SMEM)
    vmem_limit = 48 * 1024 * 1024

    # ---- phase 1: per-batch Gram matrix of PReLU(conv1(x)) -----------------
    cmat = pl.pallas_call(
        functools.partial(_sapca_phase1_kernel, n_tile=n_tile, n_valid=n_valid),
        out_shape=jax.ShapeDtypeStruct((B, C, C), jnp.float32),
        grid_spec=pltpu.PrefetchScalarGridSpec(
            num_scalar_prefetch=0,
            grid=(B, nt),
            in_specs=[
                pl.BlockSpec((1, C, n_tile), lambda b, t: (b, 0, t)),  # x
                pl.BlockSpec((C, C), const),                           # W1
                pl.BlockSpec((C, 1), const),                           # b1
                smem_spec,                                             # PReLU alpha
            ],
            out_specs=pl.BlockSpec((1, C, C), lambda b, t: (b, 0, 0)),  # resident over t
        ),
        compiler_params=pltpu.CompilerParams(
            dimension_semantics=("parallel", "arbitrary"),
            vmem_limit_bytes=vmem_limit),
    )(xf, w1, b1, a)

    # TODO(synk): torch.symeig (batched symmetric eigendecomposition) has no
    # in-kernel Pallas equivalent; it runs as plain XLA between the two kernels.
    _, evecs = jnp.linalg.eigh(cmat * (1.0 / B))        # ascending eigenvalues
    wproj = jnp.swapaxes(evecs[:, :, C - Ci:], -1, -2)  # (B, Ci, C): top-Ci rows

    # ---- phase 2: attention map + gated output (recomputes conv1/PReLU) ----
    out = pl.pallas_call(
        _sapca_phase2_kernel,
        out_shape=jax.ShapeDtypeStruct((B, C, N_pad), jnp.float32),
        grid_spec=pltpu.PrefetchScalarGridSpec(
            num_scalar_prefetch=0,
            grid=(B, nt),
            in_specs=[
                pl.BlockSpec((1, C, n_tile), lambda b, t: (b, 0, t)),  # x
                pl.BlockSpec((C, C), const),                           # W1
                pl.BlockSpec((C, 1), const),                           # b1
                smem_spec,                                             # PReLU alpha
                pl.BlockSpec((1, Ci, C), lambda b, t: (b, 0, 0)),      # PCA proj w
                pl.BlockSpec((C, Ci), const),                          # W2
                pl.BlockSpec((C, 1), const),                           # b2
            ],
            out_specs=pl.BlockSpec((1, C, n_tile), lambda b, t: (b, 0, t)),
        ),
        compiler_params=pltpu.CompilerParams(
            dimension_semantics=("parallel", "parallel"),
            vmem_limit_bytes=vmem_limit),
    )(xf, w1, b1, a, wproj, w2, b2)

    if N_pad != N:
        out = out[:, :, :N]
    return out.reshape(B, C, Hh, Ww)


def sapca_v2_ref(x, params):
    """Pure-JAX reference mirroring the PyTorch SAPCABlockV2 forward."""
    B, C, Hh, Ww = x.shape
    N = Hh * Ww
    w1, b1, a, w2, b2 = params
    Ci = w2.shape[1]

    xf = x.reshape(B, C, N)
    g = jnp.einsum('oc,bcn->bon', w1, xf) + b1[None]
    g = jnp.where(g >= 0.0, g, a.reshape(()) * g)              # PReLU
    cmat = jnp.einsum('bin,bjn->bij', g, g) / B                # / batch size
    _, evecs = jnp.linalg.eigh(cmat)                           # ascending, like symeig
    w = jnp.swapaxes(evecs[:, :, C - Ci:], -1, -2)             # (B, Ci, C)
    y = jax.nn.sigmoid(jnp.einsum('bic,bcn->bin', w, g))
    att = jnp.einsum('oi,bin->bon', w2, y) + b2[None]
    return (xf * jnp.tanh(att)).reshape(B, C, Hh, Ww)


def init_params(key, in_channels):
    C = in_channels
    assert C % 4 == 0, "SAPCABlockV2 requires in_channels divisible by 4"
    Ci = C // 4
    ks = jax.random.split(key, 4)

    def conv_init(kw, kb, c_out, c_in):
        # PyTorch Conv2d default-style uniform init.
        bound = 1.0 / (c_in ** 0.5)
        w = jax.random.uniform(kw, (c_out, c_in), jnp.float32, -bound, bound)
        b = jax.random.uniform(kb, (c_out, 1), jnp.float32, -bound, bound)
        return w, b

    w1, b1 = conv_init(ks[0], ks[1], C, C)       # conv1: C -> C
    w2, b2 = conv_init(ks[2], ks[3], C, Ci)      # conv2: C//4 -> C
    a = jnp.full((1,), 0.25, jnp.float32)        # PReLU default alpha (SMEM)
    return (w1, b1, a, w2, b2)


if __name__ == "__main__":
    key = jax.random.PRNGKey(0)
    k_x, k_par = jax.random.split(key, 2)

    B, C, Hh, Ww = 2, 8, 16, 16                  # N = 256, Ci = 2
    x = jax.random.normal(k_x, (B, C, Hh, Ww), jnp.float32)
    params = init_params(k_par, C)

    ref = sapca_v2_ref(x, params)

    # Auto-picked tile (single full-N slab in this small regime).
    out = sapca_v2_pallas(x, params)
    out = jax.block_until_ready(out)
    assert out.shape == (B, C, Hh, Ww)
    assert jnp.allclose(out, ref, atol=2e-3, rtol=2e-3), "mismatch vs reference"

    # n_tile=128 exercises the multi-tile Gram-matrix reduction path.
    out2 = sapca_v2_pallas(x, params, n_tile=128)
    out2 = jax.block_until_ready(out2)
    assert jnp.allclose(out2, ref, atol=2e-3, rtol=2e-3), "mismatch vs reference (tiled)"

    print("KERNEL_OK")
</pallas_src>

<mosaic_0001>
module attributes {stable_mosaic.version = 11 : i64} {
  func.func @_sapca_phase1_kernel(%arg0: i32, %arg1: i32, %arg2: memref<1x8x256xf32, #tpu.memory_space<vmem>>, %arg3: memref<8x8xf32, #tpu.memory_space<vmem>>, %arg4: memref<8x1xf32, #tpu.memory_space<vmem>>, %arg5: memref<1xf32, #tpu.memory_space<smem>>, %arg6: memref<1x8x8xf32, #tpu.memory_space<vmem>>) attributes {dimension_semantics = [#tpu.dimension_semantics<parallel>, #tpu.dimension_semantics<arbitrary>], iteration_bounds = array<i64: 2, 1>, scalar_prefetch = 0 : i64, scratch_operands = 0 : i64, tpu.core_type = #tpu.core_type<tc>, window_params = [{transform_indices = @transform_0, window_bounds = array<i64: 1, 8, 256>}, {pipeline_mode = #tpu.pipeline_mode<synchronous>, transform_indices = @transform_1, window_bounds = array<i64: 8, 8>}, {pipeline_mode = #tpu.pipeline_mode<synchronous>, transform_indices = @transform_2, window_bounds = array<i64: 8, 1>}, {transform_indices = @transform_3, window_bounds = array<i64: 1>}, {transform_indices = @transform_4, window_bounds = array<i64: 1, 8, 8>}]} {
    %c0 = arith.constant 0 : index
    %c0_0 = arith.constant 0 : index
    %c0_1 = arith.constant 0 : index
    %0 = vector.load %arg2[%c0, %c0_0, %c0_1] : memref<1x8x256xf32, #tpu.memory_space<vmem>>, vector<1x8x256xf32>
    %1 = vector.shape_cast %0 : vector<1x8x256xf32> to vector<8x256xf32>
    %c0_2 = arith.constant 0 : index
    %c0_3 = arith.constant 0 : index
    %2 = vector.load %arg3[%c0_2, %c0_3] : memref<8x8xf32, #tpu.memory_space<vmem>>, vector<8x8xf32>
    %cst = arith.constant dense<0.000000e+00> : vector<8x256xf32>
    %3 = tpu.matmul %2, %1, %cst {dimension_numbers = #tpu.dot_dimension_numbers<[1], [0], [0], [1], [0, 0, 1, 1], [], []>} : vector<8x8xf32>, vector<8x256xf32>, vector<8x256xf32> -> vector<8x256xf32>
    %c0_4 = arith.constant 0 : index
    %c0_5 = arith.constant 0 : index
    %4 = vector.load %arg4[%c0_4, %c0_5] : memref<8x1xf32, #tpu.memory_space<vmem>>, vector<8x1xf32>
    %5 = vector.broadcast %4 : vector<8x1xf32> to vector<8x256xf32>
    %6 = arith.addf %3, %5 : vector<8x256xf32>
    %c0_6 = arith.constant 0 : index
    %7 = memref.load %arg5[%c0_6] : memref<1xf32, #tpu.memory_space<smem>>
    %cst_7 = arith.constant 0.000000e+00 : f32
    %8 = vector.broadcast %cst_7 : f32 to vector<8x256xf32>
    %9 = arith.cmpf oge, %6, %8 : vector<8x256xf32>
    %10 = vector.broadcast %7 : f32 to vector<8x256xf32>
    %11 = arith.mulf %10, %6 : vector<8x256xf32>
    %12 = arith.select %9, %6, %11 : vector<8x256xi1>, vector<8x256xf32>
    %c0_i32 = arith.constant 0 : i32
    %13 = arith.cmpi eq, %arg1, %c0_i32 : i32
    %14 = arith.extui %13 : i1 to i32
    %c0_i32_8 = arith.constant 0 : i32
    %15 = arith.cmpi ne, %14, %c0_i32_8 : i32
    scf.if %15 {
      %cst_16 = arith.constant 0.000000e+00 : f32
      %23 = vector.broadcast %cst_16 : f32 to vector<8x8xf32>
      %c0_17 = arith.constant 0 : index
      %c0_18 = arith.constant 0 : index
      %c0_19 = arith.constant 0 : index
      %24 = vector.load %arg6[%c0_17, %c0_18, %c0_19] : memref<1x8x8xf32, #tpu.memory_space<vmem>>, vector<1x8x8xf32>
      %25 = vector.shape_cast %24 : vector<1x8x8xf32> to vector<8x8xf32>
      %26 = vector.shape_cast %23 : vector<8x8xf32> to vector<1x8x8xf32>
      tpu.vector_store %arg6[%c0_17, %c0_18, %c0_19], %26 {strides = array<i32>} : memref<1x8x8xf32, #tpu.memory_space<vmem>>, vector<1x8x8xf32>,
    } else {
    }
    %cst_9 = arith.constant dense<0.000000e+00> : vector<8x8xf32>
    %16 = tpu.matmul %12, %12, %cst_9 {dimension_numbers = #tpu.dot_dimension_numbers<[1], [1], [0], [0], [0, 0, 1, 0], [], []>} : vector<8x256xf32>, vector<8x256xf32>, vector<8x8xf32> -> vector<8x8xf32>
    %c0_10 = arith.constant 0 : index
    %c0_11 = arith.constant 0 : index
    %c0_12 = arith.constant 0 : index
    %17 = vector.load %arg6[%c0_10, %c0_11, %c0_12] : memref<1x8x8xf32, #tpu.memory_space<vmem>>, vector<1x8x8xf32>
    %18 = vector.shape_cast %17 : vector<1x8x8xf32> to vector<8x8xf32>
    %19 = arith.addf %18, %16 : vector<8x8xf32>
    %c0_13 = arith.constant 0 : index
    %c0_14 = arith.constant 0 : index
    %c0_15 = arith.constant 0 : index
    %20 = vector.load %arg6[%c0_13, %c0_14, %c0_15] : memref<1x8x8xf32, #tpu.memory_space<vmem>>, vector<1x8x8xf32>
    %21 = vector.shape_cast %20 : vector<1x8x8xf32> to vector<8x8xf32>
    %22 = vector.shape_cast %19 : vector<8x8xf32> to vector<1x8x8xf32>
    tpu.vector_store %arg6[%c0_13, %c0_14, %c0_15], %22 {strides = array<i32>} : memref<1x8x8xf32, #tpu.memory_space<vmem>>, vector<1x8x8xf32>,
    return
  }
  func.func @transform_0(%arg0: i32, %arg1: i32) -> (i32, i32, i32) {
    %c0_i32 = arith.constant 0 : i32
    %c0_i32_0 = arith.constant 0 : i32
    return %arg0, %c0_i32, %arg1 : i32, i32, i32
  }
  func.func @transform_1(%arg0: i32, %arg1: i32) -> (i32, i32) {
    %c0_i32 = arith.constant 0 : i32
    %c0_i32_0 = arith.constant 0 : i32
    %c0_i32_1 = arith.constant 0 : i32
    return %c0_i32, %c0_i32_0 : i32, i32
  }
  func.func @transform_2(%arg0: i32, %arg1: i32) -> (i32, i32) {
    %c0_i32 = arith.constant 0 : i32
    %c0_i32_0 = arith.constant 0 : i32
    %c0_i32_1 = arith.constant 0 : i32
    return %c0_i32, %c0_i32_0 : i32, i32
  }
  func.func @transform_3(%arg0: i32, %arg1: i32) -> i32 {
    %c0_i32 = arith.constant 0 : i32
    %c0_i32_0 = arith.constant 0 : i32
    return %c0_i32 : i32
  }
  func.func @transform_4(%arg0: i32, %arg1: i32) -> (i32, i32, i32) {
    %c0_i32 = arith.constant 0 : i32
    %c0_i32_0 = arith.constant 0 : i32
    %c0_i32_1 = arith.constant 0 : i32
    return %arg0, %c0_i32, %c0_i32_0 : i32, i32, i32
  }
}

</mosaic_0001>

<bundles_post_ra>
// kernel: tpu_custom_call.1
= control target key start
LH: loop header
LB: loop body
LE: loop exit
PB: predicated region body
PF: predicated region fallthrough
CT: control target
= control target key end

     0   :  { %s912_s0 = inlined_call_operand.hbm [shape: f32[2,8,256], index: 0, kind: input, shape index: {}]   ;;  %s913_s1 = inlined_call_operand.vmem [shape: f32[8,8], index: 1, kind: input, shape index: {}]   ;;  %s914_s2 = inlined_call_operand.vmem [shape: f32[8,1], index: 2, kind: input, shape index: {}]   ;;  %s915_s3 = inlined_call_operand.<no memory space> [shape: f32[1], index: 3, kind: input, shape index: {}]   ;;  %s916_s4 = inlined_call_operand.hbm [shape: f32[2,8,8], index: 4, kind: output, shape index: {}]  }
   0x1   :  { %9 = sst [smem:[#allocation2]] %s915_s3 }
   0x2   :  { %10 = vsyncpa [#allocation4], 0 }
   0x3   :  { %12 = vsyncpa [#allocation4 + $0x1], 0 }
   0x4   :  { %13 = vsyncpa [#allocation5], 0 }
   0x5   :  { %15 = vsyncpa [#allocation5 + $0x1], 0  ;;  %s724_s17 = smov 0   ;;  %s726_s18 = smov 0  }
   0x6   :  { %s728_s19 = smov 0   ;;  %s730_s20 = smov 0  }
   0x7   :  { %s732_s21 = smov 0   ;;  %s734_s22 = smov 0  }
   0x8 LB: > { %s497_s3 = sadd.s32 4294967295, %s690_s22   ;;  %s498_s23 = sadd.s32 4294967294, %s690_s22   ;;  %s690_s22 = sphi %s734_s22, %s21_s22   ;;  %s686_s21 = sphi %s732_s21, %s932_s21   ;;  %s682_s20 = sphi %s730_s20, %s931_s20   ;;  %s678_s19 = sphi %s728_s19, %s930_s19   ;;  %s674_s18 = sphi %s726_s18, %s929_s18   ;;  %s670_s17 = sphi %s724_s17, %s928_s17  }
   0x9   : > { %s33_s24 = sadd.s32 1, %s686_s21  ;;  %s42_s25 = sadd.s32 1, %s678_s19 }
   0xa   : > { %p35_p0 = scmp.ge.s32.totalorder %s33_s24, 2  ;;  %p49_p1 = scmp.ne.s32.totalorder %s678_s19, %s674_s18 }
   0xb   : > { %p50_p2 = scmp.eq.s32.totalorder %s690_s22, 0  ;;  %p55_p3 = scmp.ne.s32.totalorder %s674_s18, %s670_s17 }
   0xc   : > { %s934_s24 = smov (%p35_p0, %s33_s24), 0  ;;  %p56_p5 = scmp.eq.s32.totalorder %s497_s3, 0 }
   0xd   : > { %p765_p4 = por %p50_p2, %p49_p1  ;;  %s37_s27 = ssub.s32 %s686_s21, %s934_s24 }
   0xe   : > { %p142_p6 = scmp.eq.s32.totalorder %s497_s3, 1  ;;  %p40_p7 = scmp.eq.s32.totalorder %s37_s27, 0 }
   0xf   : > { %p771_p8 = por %p56_p5, %p55_p3  ;;  %p148_p10 = scmp.eq.s32.totalorder %s498_s23, 1 }
  0x10   : > { %p775_p9 = por %p142_p6, %p49_p1  ;;  %p525_p13 = scmp.lt.s32.totalorder %s690_s22, 2 }
  0x11   : > { %s780_s30 = scalar_select %p40_p7, %s678_s19, %s42_s25  }
  0x12   : > { %s920_s29 = scalar_select %p775_p9, 1, 0 }
  0x13   : > { %p782_p11 = por %p148_p10, %p55_p3  ;;  %s177_s6 = sand.u32 1, %s678_s19  }
  0x14   : > { %s501_s7 = sshll.u32 %s177_s6, 4  ;;  %s512_s8 = sshll.u32 %s686_s21, 8 }
  0x15   : > { %s921_s5 = scalar_select %p782_p11, 1, 0 }
  0x16   : > { %s793_s11 = scalar_lea.hbm %s912_s0, %s512_s8  ;;  %s181_s12 = scalar_lea.vmem [#allocation3], %s501_s7 }
  0x17   : > { %s191_s13 = sshll.u32 %s181_s12, 4  ;;  %p799_p0 = pnand %p525_p13, %p765_p4  ;;  %s795_s13 = int_to_ptr.vmem [resolvable:$true] %s191_s13 }
  0x18   : > { %s178_s15 = scalar_lea.sflag [#allocation4], %s177_s6  ;;  %s578_s16 = scalar_lea.hbm %s793_s11, 256 }
  0x19   : > { %p579_p3 = scmp.ne.s32.totalorder %s793_s11, %s578_s16  ;;  %p580_p5 = pneg %p799_p0 }
  0x1a   : > { %s583_s25 = scalar_lea.hbm %s912_s0, 512  ;;  %p584_p4 = scmp.lt.u32.totalorder %s793_s11, %s912_s0 }
  0x1b   : > { %p581_p6 = pnand %p580_p5, %p579_p3  ;;  %p585_p10 = scmp.lt.u32.totalorder %s583_s25, %s578_s16 }
  0x1c   : > { %p587_p12 = scmp.lt.u32.totalorder %s578_s16, %s793_s11 }
  0x1d   : > { %p582_p7 = pneg %p581_p6  ;;  %p586_p13 = por %p585_p10, %p584_p4 }
  0x1f   : > { %p588_p1 = por %p587_p12, %p586_p13 }
  0x21   : > { %p589_p2 = pnand %p588_p1, %p582_p7 }
  0x23   : > { %592 = shalt.err (!%p589_p2)
}
  0x24   : > { %s593_s6 = scalar_lea.vmem %s795_s13, 256  ;;  %s692_s7 = smov [#allocation3]  }
  0x25   : > { %p594_p3 = scmp.ne.s32.totalorder %s795_s13, %s593_s6  ;;  %s598_s8 = sshll.u32 %s692_s7, 4  ;;  %s599_s8 = int_to_ptr.vmem [resolvable:$false] %s598_s8 }
  0x26   : > { %s600_s9 = scalar_lea.vmem %s599_s8, 512  ;;  %p601_p9 = scmp.lt.s32.totalorder %s795_s13, %s599_s8 }
  0x27   : > { %p596_p6 = pnand %p594_p3, %p580_p5  ;;  %p602_p4 = scmp.lt.s32.totalorder %s600_s9, %s593_s6 }
  0x29   : > { %p597_p11 = pneg %p596_p6  ;;  %p603_p10 = por %p602_p4, %p601_p9 }
  0x2b   : > { %p604_p12 = pnand %p603_p10, %p597_p11 }
  0x2d   : > { %607 = shalt.err (!%p604_p12)
}
  0x2e   : > { %520 = dma.hbm_to_vmem [thread:$0]  (!%p799_p0), %s793_s11, 256, %s795_s13, %s178_s15  }
  0x2f   : > { %p923_p1 = scmp.lt.s32.totalorder %s690_s22, 3  ;;  %p924_p2 = scmp.ge.s32.totalorder %s690_s22, 1 }
  0x31   : > { %p197_p5 = pnand %p924_p2, %p923_p1 }
  0x32   : > { %s835_s10 = sand.u32 (!%p197_p5), 1, %s674_s18  }
  0x33   : > { %200 = sbr.rel (%p197_p5) target bundleno = 513 (0x201), region = 36  ;;  %s505_s12 = sshll.u32 (!%p197_p5), %s835_s10, 4 }
  0x34   : > { %s203_s16 = scalar_lea.sflag (!%p197_p5), [#allocation4], %s835_s10  ;;  %s206_s3 = scalar_lea.vmem (!%p197_p5), [#allocation3], %s505_s12 }
  0x3a   : > { %661 = dma.done.wait (%p771_p8), %s203_s16, 256  }
  0x3b   : > { %663 = vsyncadd (%p771_p8), %s203_s16, 4294967040  ;;  %s506_s11 = sshll.u32 %s835_s10, 3  ;;  %v693_v0 = vmov 0.0   ;;  %vm241_vm0 = vcmask 64512   ;;  %v694_v1 = vmov 0   ;;  %v233_v2 = vld [vmem:[%s206_s3 + $0x8] sm:$0xff] }
  0x3c   : > { %309 = vmatprep.mubr.f32.mxu0 %v693_v0  ;;  %577 = vset.pattern.permute.xlu0 %v694_v1  ;;  %s844_s13 = scalar_lea.vmem [#allocation6], %s506_s11  ;;  %v232_v3 = vld [vmem:[%s206_s3] sm:$0xff]  ;;  %s316_s25 = sld [smem:[#allocation2]] }
  0x3d   : > { %328 = vst.msk [vmem:[%s844_s13] sm:$0xff] %vm241_vm0, %v693_v0  ;;  %v234_v4 = vld [vmem:[%s913_s1] sm:$0xff]  ;;  %245 = vmatprep.subr.mxu0 %v233_v2  ;;  %s509_s26 = sshll.u32 %s682_s20, 7  ;;  %s416_s27 = sshll.u32 %s844_s13, 4  ;;  %s863_s27 = int_to_ptr.vmem [resolvable:$true] %s416_s27 }
  0x3e   : > { %v235_v5 = vld [vmem:[%s914_s2] sm:$0xff]  ;;  %246 = vmatpush1.msra.mxu0 %v232_v3  ;;  %s861_s8 = scalar_lea.hbm %s916_s4, %s509_s26  ;;  %s403_s9 = scalar_lea.sflag [#allocation5], %s835_s10 }
  0x3f   : > { %238 = vperm.xlu0 %577, %v235_v5   ;;  %507 = vmatmul.mubr.msk.f32.vlgmr.msra.gmra.mrb[0].mxu0 %vm241_vm0, %v234_v4  ;;  %s608_s12 = scalar_lea.vmem %s863_s27, 128  ;;  %p925_p9 = scmp.ne.s32.totalorder %s920_s29, 0 }
  0x40   : > { %p609_p8 = scmp.ne.s32.totalorder %s863_s27, %s608_s12  ;;  %s695_s20 = smov [#allocation6]  }
  0x41   : > { %s612_s16 = sshll.u32 %s695_s20, 4  ;;  %s613_s16 = int_to_ptr.vmem [resolvable:$false] %s612_s16 }
  0x42   : > { %v319_v8 = vstv %s316_s25  ;;  %p610_p11 = pnand %p609_p8, %p925_p9  ;;  %s614_s3 = scalar_lea.vmem %s613_s16, 256 }
  0x43   : > { %p615_p7 = scmp.lt.s32.totalorder %s863_s27, %s613_s16  ;;  %p616_p13 = scmp.lt.s32.totalorder %s614_s3, %s608_s12 }
  0x44   : > { %v399_v16 = vld [vmem:[%s844_s13] sm:$0xff]  ;;  %p611_p0 = pneg %p610_p11 }
  0x45   : > { %p617_p3 = por %p616_p13, %p615_p7 }
  0x47   : > { %p618_p6 = pnand %p617_p3, %p611_p0 }
  0xbe   : > { %v239_v6 = vpop.permute.xlu0 %238 }
 0x112   : > { %v311_v7 = vpop.f32.mrb[0].mxu0 }
 0x113   : > { %v312_v9 = vadd.f32 %v311_v7, %v239_v6  ;;  %v313_v10 = vpop.f32.mrb[1].mxu0 }
 0x114   : > { %v314_v11 = vadd.f32 %v313_v10, %v239_v6 }
 0x115   : > { %v320_v12 = vmul.f32 %v319_v8, %v312_v9  ;;  %vm317_vm2 = vcmp.ge.f32.partialorder %v312_v9, 0.0 }
 0x116   : > { %vm318_vm1 = vcmp.ge.f32.partialorder %v314_v11, 0.0  ;;  %v321_v13 = vmul.f32 %v319_v8, %v314_v11 }
 0x117   : > { %v322_v15 = vsel %vm317_vm2, %v312_v9, %v320_v12 }
 0x118   : > { %v323_v14 = vsel %vm318_vm1, %v314_v11, %v321_v13 }
 0x119   : > { %329 = vmatprep.subr.mxu1 %v323_v14  ;;  %393 = vmatprep.mubr.f32.mxu1 %v323_v14 }
 0x11a   : > { %330 = vmatpush1.xpose.msra.mxu1 %v322_v15 }
 0x11d   : > { %394 = vmatmul.mubr.f32.vlgmr.msra.gmra.mrb[0].mxu1 %v322_v15 }
 0x1f0   : > { %v395_v17 = vpop.f32.mrb[0].mxu1 }
 0x1f1   : > { %v400_v18 = vadd.f32 %v399_v16, %v395_v17  ;;  %v397_v19 = vpop.f32.mrb[1].mxu1 }
 0x1f3   : > { %401 = vst.msk [vmem:[%s844_s13] sm:$0xff] %vm241_vm0, %v400_v18 }
 0x1f4   : > { %621 = shalt.err (!%p618_p6)
}
 0x1f5   : > { %s622_s10 = scalar_lea.hbm %s861_s8, 128  ;;  %s626_s14 = scalar_lea.hbm %s916_s4, 256 }
 0x1f6   : > { %p623_p4 = scmp.ne.s32.totalorder %s861_s8, %s622_s10  ;;  %p627_p1 = scmp.lt.u32.totalorder %s861_s8, %s916_s4 }
 0x1f7   : > { %p628_p2 = scmp.lt.u32.totalorder %s626_s14, %s622_s10  ;;  %p630_p8 = scmp.lt.u32.totalorder %s622_s10, %s861_s8 }
 0x1f8   : > { %p624_p10 = pnand %p623_p4, %p925_p9 }
 0x1f9   : > { %p629_p5 = por %p628_p2, %p627_p1 }
 0x1fa   : > { %p625_p12 = pneg %p624_p10 }
 0x1fb   : > { %p631_p11 = por %p630_p8, %p629_p5 }
 0x1fd   : > { %p632_p0 = pnand %p631_p11, %p625_p12 }
 0x1ff   : > { %635 = shalt.err (!%p632_p0)
}
 0x200   : > { %515 = dma.vmem_to_hbm [thread:$0]  (%p925_p9), %s863_s27, 128, %s861_s8, %s403_s9  }
 0x201 PF: > { %s428_s23 = sand.u32 1, %s670_s17   ;;  %p926_p7 = scmp.ne.s32.totalorder %s921_s5, 0 }
 0x202   : > { %p927_p13 = scmp.ge.s32.totalorder %s690_s22, 2  ;;  %s429_s25 = scalar_lea.sflag [#allocation5], %s428_s23 }
 0x204   : > { %p522_p3 = pnand %p927_p13, %p926_p7 }
 0x206   : > { %665 = dma.done.wait (!%p522_p3), %s429_s25, 128  }
 0x207   : > { %667 = vsyncadd (!%p522_p3), %s429_s25, 4294967168  ;;  %s21_s22 = sadd.s32 1, %s690_s22   ;;  %s928_s17 = smov %s674_s18 }
 0x208   : > { %p18_p6 = scmp.ge.s32.totalorder %s21_s22, 4   ;;  %s929_s18 = smov %s678_s19 }
 0x209   : > { %s930_s19 = smov %s780_s30  ;;  %s931_s20 = smov %s686_s21 }
 0x20a   : > { %s932_s21 = smov %s934_s24  ;;  %20 = sbr.rel (!%p18_p6) target bundleno = 8 (0x8), region = 85 }
 0x211   :  { %434 = vsyncpa [#allocation4], 1 }
 0x212   :  { %436 = vsyncpa [#allocation4 + $0x1], 1 }
 0x213   :  { %437 = vsyncpa [#allocation5], 1 }
 0x214   :  { %439 = vsyncpa [#allocation5 + $0x1], 1 }

</bundles_post_ra>
